<compile_context>
chip_gen: v7x
topology: tpu7x:2x2x1
jax: 0.10.0
libtpu: 0.0.40
codegen_flags: <defaults>
</compile_context>

<pallas_src>
import functools

import jax
import jax.numpy as jnp
from jax import lax
from jax.experimental import pallas as pl
from jax.experimental.pallas import tpu as pltpu


def _focal_loss_kernel(*refs, gamma, use_alpha, n_total, tile_n):
    if use_alpha:
        logits_ref, labels_ref, alpha_ref, out_ref = refs
    else:
        logits_ref, labels_ref, out_ref = refs
        alpha_ref = None

    i = pl.program_id(0)

    logits = logits_ref[...].astype(jnp.float32)              # (tile_n, C)
    labels = labels_ref[...]                                   # (tile_n, 1) int32
    tn, c = logits.shape

    # validity mask for padded rows of the last (partial) tile; all math below is
    # strictly row-wise, so garbage in padded rows can never leak into valid rows,
    # and the final select discards any NaN/Inf before the partial sum.
    row_ids = lax.broadcasted_iota(jnp.int32, (tn, 1), 0) + i * tile_n
    valid = row_ids < n_total                                  # (tile_n, 1) bool

    # one-hot mask of the label class of each row (shared by all gathers)
    col_ids = lax.broadcasted_iota(jnp.int32, (tn, c), 1)      # (tile_n, C)
    onehot = col_ids == labels                                 # (tile_n, C) bool

    # numerically-stable softmax pieces over the class (lane) axis
    row_max = jnp.max(logits, axis=-1, keepdims=True)                    # (tn,1)
    exp_shift = jnp.exp(logits - row_max)                                # (tn,C)
    sum_exp = jnp.sum(exp_shift, axis=-1, keepdims=True)                 # (tn,1)

    # gather the label column from both the logits and the exp tile
    label_logit = jnp.sum(jnp.where(onehot, logits, 0.0),
                          axis=-1, keepdims=True)                        # (tn,1)
    label_exp = jnp.sum(jnp.where(onehot, exp_shift, 0.0),
                        axis=-1, keepdims=True)                          # (tn,1)

    # per-sample cross entropy (reduction='none') and pt = softmax[label]
    ce = (row_max - label_logit) + jnp.log(sum_exp)                      # (tn,1)
    pt = label_exp / sum_exp                                             # (tn,1)

    # focal modulation: integer gamma stays on the VPU (repeated multiply)
    one_minus_pt = 1.0 - pt
    if float(gamma) == int(gamma) and int(gamma) >= 0:
        gi = int(gamma)
        if gi == 0:
            mod = jnp.ones_like(one_minus_pt)
        else:
            mod = one_minus_pt
            for _ in range(gi - 1):
                mod = mod * one_minus_pt
    else:
        mod = one_minus_pt ** gamma
    focal = mod * ce

    if use_alpha:
        # at = alpha[labels]  (gather via the same one-hot mask)
        at = jnp.sum(jnp.where(onehot, alpha_ref[...], 0.0),
                     axis=-1, keepdims=True)                             # (tn,1)
        focal = at * focal

    # drop padded rows and emit this tile's partial sum (lane-dense aligned block)
    focal = jnp.where(valid, focal, 0.0)
    tile_sum = jnp.sum(focal, axis=0, keepdims=True)                     # (1,1)
    out_ref[...] = jnp.broadcast_to(tile_sum[None], out_ref.shape)       # (1,8,128)


def focal_loss(outputs, labels, gamma=2, alpha=None, tile_n=None):
    """Pallas equivalent of FocalLoss(gamma, alpha)(outputs, labels)."""
    n, c = outputs.shape
    labels2d = labels.reshape(n, 1).astype(jnp.int32)
    use_alpha = alpha is not None

    itemsize = jnp.dtype(outputs.dtype).itemsize
    row_align = 8 if itemsize >= 4 else 16          # packed sublanes for bf16/int8
    bytes_per_row = max(c * itemsize, 1)

    if tile_n is None:
        # ~4 MiB logits tile, capped at 8192 rows, aligned rows, not (much) larger
        # than the batch itself.
        tile_n = (4 * 1024 * 1024) // bytes_per_row
        tile_n = min(tile_n, 8192)
        tile_n = max(row_align, (tile_n // row_align) * row_align)
    else:
        tile_n = max(row_align,
                     ((int(tile_n) + row_align - 1) // row_align) * row_align)
    tile_n = min(tile_n, pl.cdiv(n, row_align) * row_align)
    grid_n = pl.cdiv(n, tile_n)

    in_specs = [
        pl.BlockSpec((tile_n, c), lambda i: (i, 0)),   # logits tile (streamed)
        pl.BlockSpec((tile_n, 1), lambda i: (i, 0)),   # labels tile
    ]
    args = [outputs, labels2d]
    if use_alpha:
        in_specs.append(pl.BlockSpec((1, c), lambda i: (0, 0)))  # per-class alpha
        args.append(jnp.asarray(alpha, dtype=jnp.float32).reshape(1, c))

    kernel = functools.partial(_focal_loss_kernel, gamma=gamma,
                               use_alpha=use_alpha, n_total=n, tile_n=tile_n)

    # VMEM budget: double-buffered logits + labels, f32 intermediates headroom,
    # output blocks.  Clamp under v7x's 64 MiB/TC physical VMEM.
    tile_logits_bytes = tile_n * c * itemsize
    tile_f32_bytes = tile_n * c * 4
    vmem_need = (2 * tile_logits_bytes + 2 * tile_n * 4
                 + 6 * tile_f32_bytes + 2 * 8 * 128 * 4 + (1 << 20))
    vmem_limit = int(min(max(vmem_need, 32 * 1024 * 1024), 56 * 1024 * 1024))

    cost = pl.CostEstimate(
        flops=12 * n * c,
        transcendentals=n * c + n,
        bytes_accessed=(n * c * itemsize + n * 4
                        + grid_n * 8 * 128 * 4
                        + (c * 4 if use_alpha else 0)),
    )

    partials = pl.pallas_call(
        kernel,
        out_shape=jax.ShapeDtypeStruct((grid_n, 8, 128), jnp.float32),
        grid_spec=pltpu.PrefetchScalarGridSpec(
            num_scalar_prefetch=0,
            grid=(grid_n,),
            in_specs=in_specs,
            # one aligned (8,128) block per grid step -> no resident accumulator,
            # batch axis can be sharded across TensorCores on v7x.
            out_specs=pl.BlockSpec((1, 8, 128), lambda i: (i, 0, 0)),
        ),
        compiler_params=pltpu.CompilerParams(
            dimension_semantics=("parallel",),
            vmem_limit_bytes=vmem_limit),
        cost_estimate=cost,
    )(*args)

    # reduction='mean' — tiny final sum over per-tile partials + divide stays in JAX
    return jnp.sum(partials[:, 0, 0]) / n


def _reference_focal_loss(outputs, labels, gamma=2, alpha=None):
    """Pure-JAX reference mirroring the PyTorch module."""
    logits = outputs.astype(jnp.float32)
    lse = jax.nn.logsumexp(logits, axis=-1)
    ce = lse - jnp.take_along_axis(logits, labels[:, None], axis=-1)[:, 0]
    pt = jnp.exp(-ce)
    fl = (1.0 - pt) ** gamma * ce
    if alpha is not None:
        fl = jnp.asarray(alpha, jnp.float32)[labels] * fl
    return jnp.mean(fl)


if __name__ == "__main__":
    key = jax.random.PRNGKey(0)
    k1, k2, k3, k4 = jax.random.split(key, 4)

    # default module config: gamma=2, alpha=None
    N, C = 8, 32  # 8 samples, 32 classes
    outputs = jax.random.normal(k1, (N, C), dtype=jnp.float32)
    labels = jax.random.randint(k2, (N,), 0, C, dtype=jnp.int32)

    loss = focal_loss(outputs, labels, gamma=2, alpha=None)
    jax.block_until_ready(loss)
    ref = _reference_focal_loss(outputs, labels, gamma=2, alpha=None)
    assert jnp.allclose(loss, ref, rtol=1e-5, atol=1e-5), (loss, ref)

    # alpha path (deterministic per-class weights)
    alpha = jnp.linspace(0.5, 1.5, C, dtype=jnp.float32)
    loss_a = focal_loss(outputs, labels, gamma=2, alpha=alpha)
    jax.block_until_ready(loss_a)
    ref_a = _reference_focal_loss(outputs, labels, gamma=2, alpha=alpha)
    assert jnp.allclose(loss_a, ref_a, rtol=1e-5, atol=1e-5), (loss_a, ref_a)

    # multi-tile path with a ragged last tile (N not a multiple of tile_n)
    N2 = 20
    outputs2 = jax.random.normal(k3, (N2, C), dtype=jnp.float32)
    labels2 = jax.random.randint(k4, (N2,), 0, C, dtype=jnp.int32)
    loss_t = focal_loss(outputs2, labels2, gamma=2, alpha=alpha, tile_n=8)
    jax.block_until_ready(loss_t)
    ref_t = _reference_focal_loss(outputs2, labels2, gamma=2, alpha=alpha)
    assert jnp.allclose(loss_t, ref_t, rtol=1e-5, atol=1e-5), (loss_t, ref_t)

    print("KERNEL_OK")
</pallas_src>

<mosaic_0001>
module attributes {stable_mosaic.version = 11 : i64} {
  func.func @_focal_loss_kernel(%arg0: i32, %arg1: memref<8x32xf32, #tpu.memory_space<vmem>>, %arg2: memref<8x1xi32, #tpu.memory_space<vmem>>, %arg3: memref<1x8x128xf32, #tpu.memory_space<vmem>>) attributes {dimension_semantics = [#tpu.dimension_semantics<parallel>], iteration_bounds = array<i64: 1>, scalar_prefetch = 0 : i64, scratch_operands = 0 : i64, tpu.core_type = #tpu.core_type<tc>, window_params = [{transform_indices = @transform_0, window_bounds = array<i64: 8, 32>}, {transform_indices = @transform_1, window_bounds = array<i64: 8, 1>}, {transform_indices = @transform_2, window_bounds = array<i64: 1, 8, 128>}]} {
    %c0 = arith.constant 0 : index
    %c0_0 = arith.constant 0 : index
    %0 = vector.load %arg1[%c0, %c0_0] : memref<8x32xf32, #tpu.memory_space<vmem>>, vector<8x32xf32>
    %c0_1 = arith.constant 0 : index
    %c0_2 = arith.constant 0 : index
    %1 = vector.load %arg2[%c0_1, %c0_2] : memref<8x1xi32, #tpu.memory_space<vmem>>, vector<8x1xi32>
    %2 = tpu.iota {dimensions = array<i32: 0>} : vector<8x1xi32>
    %c8_i32 = arith.constant 8 : i32
    %3 = arith.muli %arg0, %c8_i32 : i32
    %4 = vector.broadcast %3 : i32 to vector<8x1xi32>
    %5 = arith.addi %2, %4 : vector<8x1xi32>
    %c8_i32_3 = arith.constant 8 : i32
    %6 = vector.broadcast %c8_i32_3 : i32 to vector<8x1xi32>
    %7 = arith.cmpi slt, %5, %6 : vector<8x1xi32>
    %8 = tpu.iota {dimensions = array<i32: 1>} : vector<8x32xi32>
    %9 = vector.broadcast %1 : vector<8x1xi32> to vector<8x32xi32>
    %10 = arith.cmpi eq, %8, %9 : vector<8x32xi32>
    %cst = arith.constant dense<0xFF800000> : vector<8xf32>
    %11 = vector.multi_reduction <maximumf>, %0, %cst [1] : vector<8x32xf32> to vector<8xf32>
    %12 = vector.shape_cast %11 : vector<8xf32> to vector<8x1xf32>
    %13 = vector.broadcast %12 : vector<8x1xf32> to vector<8x32xf32>
    %14 = arith.subf %0, %13 : vector<8x32xf32>
    %15 = math.exp %14 : vector<8x32xf32>
    %cst_4 = arith.constant dense<0.000000e+00> : vector<8xf32>
    %16 = vector.multi_reduction <add>, %15, %cst_4 [1] : vector<8x32xf32> to vector<8xf32>
    %17 = vector.shape_cast %16 : vector<8xf32> to vector<8x1xf32>
    %cst_5 = arith.constant 0.000000e+00 : f32
    %18 = vector.broadcast %cst_5 : f32 to vector<8x32xf32>
    %19 = arith.select %10, %0, %18 : vector<8x32xi1>, vector<8x32xf32>
    %cst_6 = arith.constant dense<0.000000e+00> : vector<8xf32>
    %20 = vector.multi_reduction <add>, %19, %cst_6 [1] : vector<8x32xf32> to vector<8xf32>
    %21 = vector.shape_cast %20 : vector<8xf32> to vector<8x1xf32>
    %cst_7 = arith.constant 0.000000e+00 : f32
    %22 = vector.broadcast %cst_7 : f32 to vector<8x32xf32>
    %23 = arith.select %10, %15, %22 : vector<8x32xi1>, vector<8x32xf32>
    %cst_8 = arith.constant dense<0.000000e+00> : vector<8xf32>
    %24 = vector.multi_reduction <add>, %23, %cst_8 [1] : vector<8x32xf32> to vector<8xf32>
    %25 = vector.shape_cast %24 : vector<8xf32> to vector<8x1xf32>
    %26 = arith.subf %12, %21 : vector<8x1xf32>
    %27 = math.log %17 : vector<8x1xf32>
    %28 = arith.addf %26, %27 : vector<8x1xf32>
    %29 = arith.divf %25, %17 : vector<8x1xf32>
    %cst_9 = arith.constant 1.000000e+00 : f32
    %30 = vector.broadcast %cst_9 : f32 to vector<8x1xf32>
    %31 = arith.subf %30, %29 : vector<8x1xf32>
    %32 = arith.mulf %31, %31 : vector<8x1xf32>
    %33 = arith.mulf %32, %28 : vector<8x1xf32>
    %cst_10 = arith.constant 0.000000e+00 : f32
    %34 = vector.broadcast %cst_10 : f32 to vector<8x1xf32>
    %35 = arith.select %7, %33, %34 : vector<8x1xi1>, vector<8x1xf32>
    %cst_11 = arith.constant dense<0.000000e+00> : vector<1xf32>
    %36 = vector.multi_reduction <add>, %35, %cst_11 [0] : vector<8x1xf32> to vector<1xf32>
    %37 = vector.shape_cast %36 : vector<1xf32> to vector<1x1xf32>
    %38 = vector.shape_cast %37 : vector<1x1xf32> to vector<1x1x1xf32>
    %39 = vector.shape_cast %38 : vector<1x1x1xf32> to vector<1x1x1xf32>
    %40 = vector.broadcast %39 : vector<1x1x1xf32> to vector<1x8x128xf32>
    %c0_12 = arith.constant 0 : index
    %c0_13 = arith.constant 0 : index
    %c0_14 = arith.constant 0 : index
    %41 = vector.load %arg3[%c0_12, %c0_13, %c0_14] : memref<1x8x128xf32, #tpu.memory_space<vmem>>, vector<1x8x128xf32>
    tpu.vector_store %arg3[%c0_12, %c0_13, %c0_14], %40 {strides = array<i32>} : memref<1x8x128xf32, #tpu.memory_space<vmem>>, vector<1x8x128xf32>,
    return
  }
  func.func @transform_0(%arg0: i32) -> (i32, i32) {
    %c0_i32 = arith.constant 0 : i32
    %c0_i32_0 = arith.constant 0 : i32
    return %arg0, %c0_i32 : i32, i32
  }
  func.func @transform_1(%arg0: i32) -> (i32, i32) {
    %c0_i32 = arith.constant 0 : i32
    %c0_i32_0 = arith.constant 0 : i32
    return %arg0, %c0_i32 : i32, i32
  }
  func.func @transform_2(%arg0: i32) -> (i32, i32, i32) {
    %c0_i32 = arith.constant 0 : i32
    %c0_i32_0 = arith.constant 0 : i32
    %c0_i32_1 = arith.constant 0 : i32
    return %arg0, %c0_i32, %c0_i32_0 : i32, i32, i32
  }
}

</mosaic_0001>

<bundles_post_ra>
// kernel: tpu_custom_call.1
= control target key start
LH: loop header
LB: loop body
LE: loop exit
PB: predicated region body
PF: predicated region fallthrough
CT: control target
= control target key end

     0   :  { %vm26_vm0 = vcmask 261120   ;;  %s147_s0 = inlined_call_operand.vmem [shape: f32[8,32], index: 0, kind: input, shape index: {}]   ;;  %s148_s1 = inlined_call_operand.vmem [shape: s32[8,1], index: 1, kind: input, shape index: {}]   ;;  %s149_s2 = inlined_call_operand.hbm [shape: f32[1,8,128], index: 2, kind: output, shape index: {}]  }
   0x1   :  { %v12_v0 = vld [vmem:[%s147_s0] sm:$0xff] }
   0x2   :  { %7 = vsyncpa [#allocation3], 0  ;;  %v27_v1 = vsel %vm26_vm0, %v12_v0, -inf  ;;  %v108_v2 = vmov 0   ;;  %v13_v3 = vld [vmem:[%s148_s1] sm:$0xff]  ;;  %v20_v7 = vlaneseq  ;;  %s109_s0 = smov [#allocation2]  }
   0x3   :  { %77 = vset.pattern.permute.xlu0 %v108_v2  ;;  %s67_s1 = sshll.u32 %s109_s0, 4  ;;  %s68_s1 = int_to_ptr.vmem [resolvable:$true] %s67_s1 }
   0x4   :  { %28 = vmax.xlane.f32.xlu0 %v27_v1  ;;  %v21_v8 = vand.u32 127, %v20_v7  ;;  %s84_s13 = scalar_lea.vmem %s68_s1, 128  ;;  %p89_p1 = scmp.lt.s32.totalorder %s68_s1, %s68_s1 }
   0x5   :  { %p85_p0 = scmp.ne.s32.totalorder %s68_s1, %s84_s13  ;;  %p90_p2 = scmp.lt.s32.totalorder %s84_s13, %s84_s13 }
   0x7   :  { %p91_p3 = por %p90_p2, %p89_p1 }
   0x9   :  { %p92_p4 = pnand %p91_p3, %p85_p0 }
  0x1a   :  { %23 = vperm.xlu0 %77, %v13_v3  }
  0x91   :  { %v29_v4 = vpop.xlane.xlu0 %28 }
  0x92   :  { %v30_v5 = vsub.f32 %v12_v0, %v29_v4 }
  0x94   :  { %v31_v6 = vmul.f32 1.442695, %v30_v5 }
  0x96   :  { %78 = vpow2.f32 %v31_v6 }
  0x99   :  { %v24_v9 = vpop.permute.xlu0 %23 }
  0x9a   :  { %vm25_vm1 = vcmp.eq.s32.totalorder %v21_v8, %v24_v9 }
  0x9b   :  { %v36_v13 = vsel %vm25_vm1, %v12_v0, 0.0 }
  0x9c   :  { %v37_v15 = vsel %vm26_vm0, %v36_v13, 0.0 }
  0xa0   :  { %v79_v10 = vpop.eup %78 }
  0xa1   :  { %v33_v11 = vsel %vm26_vm0, %v79_v10, 0.0  ;;  %v40_v12 = vsel %vm25_vm1, %v79_v10, 0.0 }
  0xa2   :  { %34 = vadd.xlane.f32.xlu1 %v33_v11  ;;  %v41_v14 = vsel %vm26_vm0, %v40_v12, 0.0 }
  0xa6   :  { %42 = vadd.xlane.f32.xlu1 %v41_v14 }
  0xaa   :  { %38 = vadd.xlane.f32.xlu1 %v37_v15 }
 0x12f   :  { %v35_v16 = vpop.xlane.xlu1 %34 }
 0x130   :  { %80 = vlog2.f32 %v35_v16 }
 0x131   :  { %82 = vrcp.f32 %v35_v16 }
 0x133   :  { %v43_v17 = vpop.xlane.xlu1 %42 }
 0x137   :  { %v39_v20 = vpop.xlane.xlu1 %38 }
 0x138   :  { %v44_v24 = vsub.f32 %v29_v4, %v39_v20 }
 0x13a   :  { %v81_v18 = vpop.eup %80 }
 0x13b   :  { %v83_v19 = vpop.eup %82  ;;  %v46_v22 = vmul.f32 0.6931472, %v81_v18 }
 0x13c   :  { %v49_v21 = vmul.f32 %v83_v19, %v43_v17 }
 0x13d   :  { %v47_v26 = vadd.f32 %v46_v22, %v44_v24 }
 0x13e   :  { %v50_v23 = vsub.f32 1.0, %v49_v21 }
 0x140   :  { %v51_v25 = vmul.f32 %v50_v23, %v50_v23 }
 0x142   :  { %v52_v27 = vmul.f32 %v51_v25, %v47_v26 }
 0x144   :  { %v54_v28 = vrot.slane %v52_v27, 4 }
 0x146   :  { %v55_v29 = vadd.f32 %v54_v28, %v52_v27 }
 0x148   :  { %v56_v30 = vrot.slane %v55_v29, 2 }
 0x14a   :  { %v57_v31 = vadd.f32 %v56_v30, %v55_v29 }
 0x14c   :  { %v58_v32 = vrot.slane %v57_v31, 1 }
 0x14e   :  { %v59_v33 = vadd.f32 %v58_v32, %v57_v31 }
 0x150   :  { %60 = vst [vmem:[#allocation2] sm:$0xff] %v59_v33 }
 0x151   :  { %95 = shalt.err (!%p92_p4)
}
 0x152   :  { %s96_s16 = scalar_lea.hbm %s149_s2, 128 }
 0x153   :  { %p97_p5 = scmp.ne.s32.totalorder %s149_s2, %s96_s16  ;;  %p100_p6 = scmp.lt.u32.totalorder %s96_s16, %s149_s2 }
 0x155   :  { %p102_p7 = pnand %p100_p6, %p97_p5 }
 0x157   :  { %105 = shalt.err (!%p102_p7)
}
 0x158   :  { %70 = dma.vmem_to_hbm [thread:$0]  %s68_s1, 128, %s149_s2, [#allocation3]  }
 0x159   :  { %106 = dma.done.wait [#allocation3], 128  }
 0x15a   :  { %107 = vsyncadd [#allocation3], 4294967168 }
 0x15b   :  { %74 = vsyncpa [#allocation3], 1 }

</bundles_post_ra>
